<compile_context>
chip_gen: v7x
topology: tpu7x:2x2x1
jax: 0.10.0
libtpu: 0.0.40
codegen_flags: <defaults>
</compile_context>

<pallas_src>
import jax
import jax.numpy as jnp
from jax import lax
from jax.experimental import pallas as pl
from jax.experimental.pallas import tpu as pltpu

EPS = 1e-5


def _round_up(v, m):
    return (v + m - 1) // m * m


def _pick_tb(N, H, W, Hp, Wp, conv_itemsize, budget_bytes=28 << 20, max_tb=64):
    """Batch elements per grid step (divides N, bounded by a VMEM budget)."""
    # Double-buffered x block + double-buffered conv block, per image.
    per_image = 2 * 3 * H * W * 4 + 2 * Hp * Wp * conv_itemsize
    # Luma scratch + stencil temporaries + accumulators (independent of TB).
    fixed = 10 * Hp * Wp * 4
    tb = int(max(1, min(N, max_tb,
                        (budget_bytes - fixed) // max(per_image, 1))))
    while N % tb:
        tb -= 1
    return tb


def _vmem_limit(need_bytes):
    """Scoped-VMEM cap: raise above the 32 MiB default only when the blocks
    need it; never above v7x's 64 MiB physical VMEM."""
    return int(min(max(need_bytes * 5 // 4 + (4 << 20), 32 << 20), 64 << 20))


def _make_stats_kernel(TB, H, W, Hp, Wp):
    """Kernel A: luma -> zero-padded 3x3 laplacian conv -> partial sum/ssq."""

    def kernel(x_ref, conv_ref, psum_ref, pssq_ref, ypad_ref):
        # x_ref:    (TB, 3, H, W)   RGB block (unpadded: DMA reads only true px)
        # conv_ref: (TB, Hp, Wp)    lane-dense padded conv output block
        # psum_ref, pssq_ref: (1, 1, 1) per-block partial statistics
        # ypad_ref: (Hp, Wp)        zero-padded luma scratch (VMEM)

        # Re-zero only the padded border each step (the interior [0:H, 0:W] is
        # overwritten per image below).  Cannot zero just once at
        # program_id == 0: the grid axis is 'parallel', so steps may be split
        # across TensorCores, each with its own scratch.
        ypad_ref[H:, :] = jnp.zeros((Hp - H, Wp), jnp.float32)
        ypad_ref[:H, W:] = jnp.zeros((H, Wp - W), jnp.float32)

        # Hoisted valid-pixel mask (padded pixels must not pollute the batch
        # statistics).  Built from (Hp,1)/(1,Wp) iotas and combined at the i32
        # level so only a single (Hp, Wp) plane is materialized.
        row = lax.broadcasted_iota(jnp.int32, (Hp, 1), 0)
        col = lax.broadcasted_iota(jnp.int32, (1, Wp), 1)
        valid = jnp.minimum((H - 1) - row, (W - 1) - col) >= 0   # (Hp, Wp)

        def one_image(b):
            xb = x_ref[b]                                        # (3, H, W)
            y = 0.299 * xb[0] + 0.587 * xb[1] + 0.114 * xb[2]    # luma
            ypad_ref[:H, :W] = y                                 # interior only
            yp = ypad_ref[...]                                   # (Hp, Wp) aligned
            # Separable 3x3 box sum.  The >=1-px zero border means every roll
            # wrap-around brings in zeros, so conv2d's zero padding is exact
            # and no edge masks are needed.
            h3 = (yp + pltpu.roll(yp, 1, axis=1)
                  + pltpu.roll(yp, Wp - 1, axis=1))
            box = (h3 + pltpu.roll(h3, 1, axis=0)
                   + pltpu.roll(h3, Hp - 1, axis=0))
            # [[-1,-1,-1],[-1,8,-1],[-1,-1,-1]]  ==  9*y - box3x3(y)
            conv = jnp.where(valid, 9.0 * yp - box, 0.0)
            conv_ref[b] = conv.astype(conv_ref.dtype)
            return conv

        if TB == 1:
            conv = one_image(0)
            s = jnp.sum(conv)
            q = jnp.sum(conv * conv)
        else:
            def body(b, carry):
                acc_s, acc_q = carry
                conv = one_image(b)
                return acc_s + conv, acc_q + conv * conv

            zero = jnp.zeros((Hp, Wp), jnp.float32)
            acc_s, acc_q = lax.fori_loop(0, TB, body, (zero, zero),
                                         unroll=TB <= 4)
            # Single cross-lane reduction per grid step (not per image).
            s = jnp.sum(acc_s)
            q = jnp.sum(acc_q)

        psum_ref[...] = jnp.reshape(s, (1, 1, 1))
        pssq_ref[...] = jnp.reshape(q, (1, 1, 1))

    return kernel


def _make_bn_kernel(H, W):
    def kernel(params_ref, conv_ref, out_ref):
        # params_ref: (2,) f32 in SMEM -> [scale, shift]
        # conv_ref:   (TB, Hp, Wp) lane-dense padded conv block
        # out_ref:    (TB, H, W)   (output channel dim squeezed via None)
        out_ref[...] = (conv_ref[:, :H, :W].astype(jnp.float32)
                        * params_ref[0] + params_ref[1])

    return kernel


def sobel_conv(x, *, block_batch=None, conv_dtype=jnp.float32):
    # layout: NCHW
    N, C, H, W = x.shape
    assert C == 3, "Sobel_conv expects RGB input (N, 3, H, W)"
    x = x.astype(jnp.float32)

    # Stencil domain padded to the native f32 (8, 128) tile AND by >= 1 pixel
    # in each spatial dim, so the pltpu.roll fast path always applies and the
    # roll wrap-around rows/cols are guaranteed zero.
    Hp = _round_up(H + 1, 8)
    Wp = _round_up(W + 1, 128)
    csize = jnp.dtype(conv_dtype).itemsize

    TB = block_batch or _pick_tb(N, H, W, Hp, Wp, csize)
    assert N % TB == 0
    G = N // TB

    # --- Pass 1: luma + 3x3 conv + per-block batch statistics --------------
    need1 = TB * (2 * 3 * H * W * 4 + 2 * Hp * Wp * csize) + 10 * Hp * Wp * 4
    conv, psum, pssq = pl.pallas_call(
        _make_stats_kernel(TB, H, W, Hp, Wp),
        out_shape=(
            jax.ShapeDtypeStruct((N, Hp, Wp), conv_dtype),
            jax.ShapeDtypeStruct((G, 1, 1), jnp.float32),
            jax.ShapeDtypeStruct((G, 1, 1), jnp.float32),
        ),
        grid_spec=pltpu.PrefetchScalarGridSpec(
            num_scalar_prefetch=0,
            grid=(G,),
            in_specs=[pl.BlockSpec((TB, C, H, W), lambda n: (n, 0, 0, 0))],
            out_specs=(
                pl.BlockSpec((TB, Hp, Wp), lambda n: (n, 0, 0)),
                pl.BlockSpec((1, 1, 1), lambda n: (n, 0, 0)),
                pl.BlockSpec((1, 1, 1), lambda n: (n, 0, 0)),
            ),
            scratch_shapes=[pltpu.VMEM((Hp, Wp), jnp.float32)],
        ),
        compiler_params=pltpu.CompilerParams(
            dimension_semantics=("parallel",),
            vmem_limit_bytes=_vmem_limit(need1)),
    )(x)

    # --- BatchNorm affine terms (two scalars, computed once in plain JAX) --
    count = jnp.float32(N * H * W)
    gamma, beta = 1.0, 0.0                      # nn.BatchNorm2d(1) default init
    mean = jnp.sum(psum) / count
    var = jnp.sum(pssq) / count - mean * mean   # biased var (training-mode BN)
    scale = gamma * lax.rsqrt(var + EPS)
    shift = beta - mean * scale
    params = jnp.stack([scale, shift]).astype(jnp.float32)   # (2,)

    # --- Pass 2: elementwise normalize (single FMA per element) ------------
    need2 = TB * (2 * Hp * Wp * csize + 2 * H * W * 4)
    out = pl.pallas_call(
        _make_bn_kernel(H, W),
        out_shape=jax.ShapeDtypeStruct((N, 1, H, W), jnp.float32),
        grid_spec=pltpu.PrefetchScalarGridSpec(
            num_scalar_prefetch=0,
            grid=(G,),
            in_specs=[
                pl.BlockSpec(memory_space=pltpu.MemorySpace.SMEM),
                pl.BlockSpec((TB, Hp, Wp), lambda n: (n, 0, 0)),
            ],
            out_specs=pl.BlockSpec((TB, None, H, W), lambda n: (n, 0, 0, 0)),
        ),
        compiler_params=pltpu.CompilerParams(
            dimension_semantics=("parallel",),
            vmem_limit_bytes=_vmem_limit(need2)),
    )(params, conv)
    return out


def _reference(x):
    # Pure-JAX reference of the same semantics, for a sanity check.
    x = x.astype(jnp.float32)
    y = 0.299 * x[:, 0] + 0.587 * x[:, 1] + 0.114 * x[:, 2]     # (N, H, W)
    w = jnp.array([[-1., -1., -1.], [-1., 8., -1.], [-1., -1., -1.]],
                  dtype=jnp.float32).reshape(1, 1, 3, 3)
    conv = lax.conv_general_dilated(
        y[:, None], w, window_strides=(1, 1), padding=((1, 1), (1, 1)),
        dimension_numbers=("NCHW", "OIHW", "NCHW"))
    mean = jnp.mean(conv)
    var = jnp.var(conv)  # biased
    return (conv - mean) * lax.rsqrt(var + EPS)


if __name__ == "__main__":
    key = jax.random.PRNGKey(0)
    x = jax.random.uniform(key, (2, 3, 16, 16), dtype=jnp.float32)

    out = jax.jit(sobel_conv)(x)
    out = jax.block_until_ready(out)

    ref = _reference(x)
    assert out.shape == (2, 1, 16, 16), out.shape
    assert jnp.allclose(out, ref, atol=1e-3, rtol=1e-3), (
        float(jnp.max(jnp.abs(out - ref))))
    print("KERNEL_OK")
</pallas_src>

<mosaic_0001>
module attributes {stable_mosaic.version = 11 : i64} {
  func.func @kernel(%arg0: i32, %arg1: memref<2xf32, #tpu.memory_space<smem>>, %arg2: memref<2x24x128xf32, #tpu.memory_space<vmem>>, %arg3: memref<2x1x16x16xf32, #tpu.memory_space<vmem>>) attributes {dimension_semantics = [#tpu.dimension_semantics<parallel>], iteration_bounds = array<i64: 1>, scalar_prefetch = 0 : i64, scratch_operands = 0 : i64, tpu.core_type = #tpu.core_type<tc>, window_params = [{transform_indices = @transform_0, window_bounds = array<i64: 2>}, {transform_indices = @transform_1, window_bounds = array<i64: 2, 24, 128>}, {transform_indices = @transform_2, window_bounds = array<i64: 2, 1, 16, 16>}]} {
    %c0 = arith.constant 0 : index
    %c0_0 = arith.constant 0 : index
    %c0_1 = arith.constant 0 : index
    %0 = vector.load %arg2[%c0, %c0_0, %c0_1] : memref<2x24x128xf32, #tpu.memory_space<vmem>>, vector<2x16x16xf32>
    %c0_2 = arith.constant 0 : index
    %1 = memref.load %arg1[%c0_2] : memref<2xf32, #tpu.memory_space<smem>>
    %2 = vector.broadcast %1 : f32 to vector<2x16x16xf32>
    %3 = arith.mulf %0, %2 : vector<2x16x16xf32>
    %c1 = arith.constant 1 : index
    %4 = memref.load %arg1[%c1] : memref<2xf32, #tpu.memory_space<smem>>
    %5 = vector.broadcast %4 : f32 to vector<2x16x16xf32>
    %6 = arith.addf %3, %5 : vector<2x16x16xf32>
    %c0_3 = arith.constant 0 : index
    %c0_4 = arith.constant 0 : index
    %c0_5 = arith.constant 0 : index
    %c0_6 = arith.constant 0 : index
    %7 = vector.load %arg3[%c0_3, %c0_4, %c0_5, %c0_6] : memref<2x1x16x16xf32, #tpu.memory_space<vmem>>, vector<2x1x16x16xf32>
    %8 = vector.shape_cast %7 : vector<2x1x16x16xf32> to vector<2x16x16xf32>
    %9 = vector.shape_cast %6 : vector<2x16x16xf32> to vector<2x1x16x16xf32>
    tpu.vector_store %arg3[%c0_3, %c0_4, %c0_5, %c0_6], %9 {strides = array<i32>} : memref<2x1x16x16xf32, #tpu.memory_space<vmem>>, vector<2x1x16x16xf32>,
    return
  }
  func.func @transform_0(%arg0: i32) -> i32 {
    %c0_i32 = arith.constant 0 : i32
    %c0_i32_0 = arith.constant 0 : i32
    return %c0_i32 : i32
  }
  func.func @transform_1(%arg0: i32) -> (i32, i32, i32) {
    %c0_i32 = arith.constant 0 : i32
    %c0_i32_0 = arith.constant 0 : i32
    %c0_i32_1 = arith.constant 0 : i32
    return %arg0, %c0_i32, %c0_i32_0 : i32, i32, i32
  }
  func.func @transform_2(%arg0: i32) -> (i32, i32, i32, i32) {
    %c0_i32 = arith.constant 0 : i32
    %c0_i32_0 = arith.constant 0 : i32
    %c0_i32_1 = arith.constant 0 : i32
    %c0_i32_2 = arith.constant 0 : i32
    return %arg0, %c0_i32, %c0_i32_0, %c0_i32_1 : i32, i32, i32, i32
  }
}

module attributes {stable_mosaic.version = 11 : i64} {
  func.func @kernel(%arg0: i32, %arg1: memref<2x3x16x16xf32, #tpu.memory_space<vmem>>, %arg2: memref<2x24x128xf32, #tpu.memory_space<vmem>>, %arg3: memref<1x1x1xf32, #tpu.memory_space<vmem>>, %arg4: memref<1x1x1xf32, #tpu.memory_space<vmem>>, %arg5: memref<24x128xf32, #tpu.memory_space<vmem>>) attributes {dimension_semantics = [#tpu.dimension_semantics<parallel>], iteration_bounds = array<i64: 1>, scalar_prefetch = 0 : i64, scratch_operands = 1 : i64, tpu.core_type = #tpu.core_type<tc>, window_params = [{transform_indices = @transform_0, window_bounds = array<i64: 2, 3, 16, 16>}, {transform_indices = @transform_1, window_bounds = array<i64: 2, 24, 128>}, {transform_indices = @transform_2, window_bounds = array<i64: 1, 1, 1>}, {transform_indices = @transform_3, window_bounds = array<i64: 1, 1, 1>}]} {
    %cst = arith.constant 0.000000e+00 : f32
    %0 = vector.broadcast %cst : f32 to vector<8x128xf32>
    %c16 = arith.constant 16 : index
    %c0 = arith.constant 0 : index
    %1 = vector.load %arg5[%c16, %c0] : memref<24x128xf32, #tpu.memory_space<vmem>>, vector<8x128xf32>
    tpu.vector_store %arg5[%c16, %c0], %0 {strides = array<i32>} : memref<24x128xf32, #tpu.memory_space<vmem>>, vector<8x128xf32>,
    %cst_0 = arith.constant 0.000000e+00 : f32
    %2 = vector.broadcast %cst_0 : f32 to vector<16x112xf32>
    %c0_1 = arith.constant 0 : index
    %c16_2 = arith.constant 16 : index
    %3 = vector.load %arg5[%c0_1, %c16_2] : memref<24x128xf32, #tpu.memory_space<vmem>>, vector<16x112xf32>
    tpu.vector_store %arg5[%c0_1, %c16_2], %2 {strides = array<i32>} : memref<24x128xf32, #tpu.memory_space<vmem>>, vector<16x112xf32>,
    %4 = tpu.iota {dimensions = array<i32: 0>} : vector<24x1xi32>
    %5 = tpu.iota {dimensions = array<i32: 1>} : vector<1x128xi32>
    %c15_i32 = arith.constant 15 : i32
    %6 = vector.broadcast %c15_i32 : i32 to vector<24x1xi32>
    %7 = arith.subi %6, %4 : vector<24x1xi32>
    %c15_i32_3 = arith.constant 15 : i32
    %8 = vector.broadcast %c15_i32_3 : i32 to vector<1x128xi32>
    %9 = arith.subi %8, %5 : vector<1x128xi32>
    %10 = vector.broadcast %7 : vector<24x1xi32> to vector<24x128xi32>
    %11 = vector.broadcast %9 : vector<1x128xi32> to vector<24x128xi32>
    %12 = arith.minsi %10, %11 : vector<24x128xi32>
    %c0_i32 = arith.constant 0 : i32
    %13 = vector.broadcast %c0_i32 : i32 to vector<24x128xi32>
    %14 = arith.cmpi sge, %12, %13 : vector<24x128xi32>
    %cst_4 = arith.constant 0.000000e+00 : f32
    %15 = vector.broadcast %cst_4 : f32 to vector<24x128xf32>
    %c0_i32_5 = arith.constant 0 : i32
    %16 = arith.index_cast %c0_i32_5 : i32 to index
    %c0_6 = arith.constant 0 : index
    %c0_7 = arith.constant 0 : index
    %c0_8 = arith.constant 0 : index
    %17 = vector.load %arg1[%16, %c0_6, %c0_7, %c0_8] : memref<2x3x16x16xf32, #tpu.memory_space<vmem>>, vector<1x3x16x16xf32>
    %18 = vector.shape_cast %17 : vector<1x3x16x16xf32> to vector<3x16x16xf32>
    %19 = vector.extract_strided_slice %18 {offsets = [0, 0, 0], sizes = [1, 16, 16], strides = [1, 1, 1]} : vector<3x16x16xf32> to vector<1x16x16xf32>
    %20 = vector.shape_cast %19 : vector<1x16x16xf32> to vector<16x16xf32>
    %cst_9 = arith.constant 2.990000e-01 : f32
    %21 = vector.broadcast %cst_9 : f32 to vector<16x16xf32>
    %22 = arith.mulf %21, %20 : vector<16x16xf32>
    %23 = vector.extract_strided_slice %18 {offsets = [1, 0, 0], sizes = [1, 16, 16], strides = [1, 1, 1]} : vector<3x16x16xf32> to vector<1x16x16xf32>
    %24 = vector.shape_cast %23 : vector<1x16x16xf32> to vector<16x16xf32>
    %cst_10 = arith.constant 5.870000e-01 : f32
    %25 = vector.broadcast %cst_10 : f32 to vector<16x16xf32>
    %26 = arith.mulf %25, %24 : vector<16x16xf32>
    %27 = arith.addf %22, %26 : vector<16x16xf32>
    %28 = vector.extract_strided_slice %18 {offsets = [2, 0, 0], sizes = [1, 16, 16], strides = [1, 1, 1]} : vector<3x16x16xf32> to vector<1x16x16xf32>
    %29 = vector.shape_cast %28 : vector<1x16x16xf32> to vector<16x16xf32>
    %cst_11 = arith.constant 1.140000e-01 : f32
    %30 = vector.broadcast %cst_11 : f32 to vector<16x16xf32>
    %31 = arith.mulf %30, %29 : vector<16x16xf32>
    %32 = arith.addf %27, %31 : vector<16x16xf32>
    %c0_12 = arith.constant 0 : index
    %c0_13 = arith.constant 0 : index
    %33 = vector.load %arg5[%c0_12, %c0_13] : memref<24x128xf32, #tpu.memory_space<vmem>>, vector<16x16xf32>
    tpu.vector_store %arg5[%c0_12, %c0_13], %32 {strides = array<i32>} : memref<24x128xf32, #tpu.memory_space<vmem>>, vector<16x16xf32>,
    %c0_14 = arith.constant 0 : index
    %c0_15 = arith.constant 0 : index
    %34 = vector.load %arg5[%c0_14, %c0_15] : memref<24x128xf32, #tpu.memory_space<vmem>>, vector<24x128xf32>
    %c1_i32 = arith.constant 1 : i32
    %35 = tpu.dynamic_rotate %34 by %c1_i32 dim 1 : vector<24x128xf32>, i32 -> vector<24x128xf32>
    %36 = arith.addf %34, %35 : vector<24x128xf32>
    %c127_i32 = arith.constant 127 : i32
    %37 = tpu.dynamic_rotate %34 by %c127_i32 dim 1 : vector<24x128xf32>, i32 -> vector<24x128xf32>
    %38 = arith.addf %36, %37 : vector<24x128xf32>
    %c1_i32_16 = arith.constant 1 : i32
    %39 = tpu.dynamic_rotate %38 by %c1_i32_16 dim 0 : vector<24x128xf32>, i32 -> vector<24x128xf32>
    %40 = arith.addf %38, %39 : vector<24x128xf32>
    %c23_i32 = arith.constant 23 : i32
    %41 = tpu.dynamic_rotate %38 by %c23_i32 dim 0 : vector<24x128xf32>, i32 -> vector<24x128xf32>
    %42 = arith.addf %40, %41 : vector<24x128xf32>
    %cst_17 = arith.constant 9.000000e+00 : f32
    %43 = vector.broadcast %cst_17 : f32 to vector<24x128xf32>
    %44 = arith.mulf %43, %34 : vector<24x128xf32>
    %45 = arith.subf %44, %42 : vector<24x128xf32>
    %cst_18 = arith.constant 0.000000e+00 : f32
    %46 = vector.broadcast %cst_18 : f32 to vector<24x128xf32>
    %47 = arith.select %14, %45, %46 : vector<24x128xi1>, vector<24x128xf32>
    %48 = arith.index_cast %c0_i32_5 : i32 to index
    %c0_19 = arith.constant 0 : index
    %c0_20 = arith.constant 0 : index
    %49 = vector.load %arg2[%48, %c0_19, %c0_20] : memref<2x24x128xf32, #tpu.memory_space<vmem>>, vector<1x24x128xf32>
    %50 = vector.shape_cast %49 : vector<1x24x128xf32> to vector<24x128xf32>
    %51 = vector.shape_cast %47 : vector<24x128xf32> to vector<1x24x128xf32>
    tpu.vector_store %arg2[%48, %c0_19, %c0_20], %51 {strides = array<i32>} : memref<2x24x128xf32, #tpu.memory_space<vmem>>, vector<1x24x128xf32>,
    %52 = arith.addf %15, %47 : vector<24x128xf32>
    %53 = arith.mulf %47, %47 : vector<24x128xf32>
    %54 = arith.addf %15, %53 : vector<24x128xf32>
    %c1_i32_21 = arith.constant 1 : i32
    %55 = arith.index_cast %c1_i32_21 : i32 to index
    %c0_22 = arith.constant 0 : index
    %c0_23 = arith.constant 0 : index
    %c0_24 = arith.constant 0 : index
    %56 = vector.load %arg1[%55, %c0_22, %c0_23, %c0_24] : memref<2x3x16x16xf32, #tpu.memory_space<vmem>>, vector<1x3x16x16xf32>
    %57 = vector.shape_cast %56 : vector<1x3x16x16xf32> to vector<3x16x16xf32>
    %58 = vector.extract_strided_slice %57 {offsets = [0, 0, 0], sizes = [1, 16, 16], strides = [1, 1, 1]} : vector<3x16x16xf32> to vector<1x16x16xf32>
    %59 = vector.shape_cast %58 : vector<1x16x16xf32> to vector<16x16xf32>
    %cst_25 = arith.constant 2.990000e-01 : f32
    %60 = vector.broadcast %cst_25 : f32 to vector<16x16xf32>
    %61 = arith.mulf %60, %59 : vector<16x16xf32>
    %62 = vector.extract_strided_slice %57 {offsets = [1, 0, 0], sizes = [1, 16, 16], strides = [1, 1, 1]} : vector<3x16x16xf32> to vector<1x16x16xf32>
    %63 = vector.shape_cast %62 : vector<1x16x16xf32> to vector<16x16xf32>
    %cst_26 = arith.constant 5.870000e-01 : f32
    %64 = vector.broadcast %cst_26 : f32 to vector<16x16xf32>
    %65 = arith.mulf %64, %63 : vector<16x16xf32>
    %66 = arith.addf %61, %65 : vector<16x16xf32>
    %67 = vector.extract_strided_slice %57 {offsets = [2, 0, 0], sizes = [1, 16, 16], strides = [1, 1, 1]} : vector<3x16x16xf32> to vector<1x16x16xf32>
    %68 = vector.shape_cast %67 : vector<1x16x16xf32> to vector<16x16xf32>
    %cst_27 = arith.constant 1.140000e-01 : f32
    %69 = vector.broadcast %cst_27 : f32 to vector<16x16xf32>
    %70 = arith.mulf %69, %68 : vector<16x16xf32>
    %71 = arith.addf %66, %70 : vector<16x16xf32>
    %c0_28 = arith.constant 0 : index
    %c0_29 = arith.constant 0 : index
    %72 = vector.load %arg5[%c0_28, %c0_29] : memref<24x128xf32, #tpu.memory_space<vmem>>, vector<16x16xf32>
    tpu.vector_store %arg5[%c0_28, %c0_29], %71 {strides = array<i32>} : memref<24x128xf32, #tpu.memory_space<vmem>>, vector<16x16xf32>,
    %c0_30 = arith.constant 0 : index
    %c0_31 = arith.constant 0 : index
    %73 = vector.load %arg5[%c0_30, %c0_31] : memref<24x128xf32, #tpu.memory_space<vmem>>, vector<24x128xf32>
    %c1_i32_32 = arith.constant 1 : i32
    %74 = tpu.dynamic_rotate %73 by %c1_i32_32 dim 1 : vector<24x128xf32>, i32 -> vector<24x128xf32>
    %75 = arith.addf %73, %74 : vector<24x128xf32>
    %c127_i32_33 = arith.constant 127 : i32
    %76 = tpu.dynamic_rotate %73 by %c127_i32_33 dim 1 : vector<24x128xf32>, i32 -> vector<24x128xf32>
    %77 = arith.addf %75, %76 : vector<24x128xf32>
    %c1_i32_34 = arith.constant 1 : i32
    %78 = tpu.dynamic_rotate %77 by %c1_i32_34 dim 0 : vector<24x128xf32>, i32 -> vector<24x128xf32>
    %79 = arith.addf %77, %78 : vector<24x128xf32>
    %c23_i32_35 = arith.constant 23 : i32
    %80 = tpu.dynamic_rotate %77 by %c23_i32_35 dim 0 : vector<24x128xf32>, i32 -> vector<24x128xf32>
    %81 = arith.addf %79, %80 : vector<24x128xf32>
    %cst_36 = arith.constant 9.000000e+00 : f32
    %82 = vector.broadcast %cst_36 : f32 to vector<24x128xf32>
    %83 = arith.mulf %82, %73 : vector<24x128xf32>
    %84 = arith.subf %83, %81 : vector<24x128xf32>
    %cst_37 = arith.constant 0.000000e+00 : f32
    %85 = vector.broadcast %cst_37 : f32 to vector<24x128xf32>
    %86 = arith.select %14, %84, %85 : vector<24x128xi1>, vector<24x128xf32>
    %87 = arith.index_cast %c1_i32_21 : i32 to index
    %c0_38 = arith.constant 0 : index
    %c0_39 = arith.constant 0 : index
    %88 = vector.load %arg2[%87, %c0_38, %c0_39] : memref<2x24x128xf32, #tpu.memory_space<vmem>>, vector<1x24x128xf32>
    %89 = vector.shape_cast %88 : vector<1x24x128xf32> to vector<24x128xf32>
    %90 = vector.shape_cast %86 : vector<24x128xf32> to vector<1x24x128xf32>
    tpu.vector_store %arg2[%87, %c0_38, %c0_39], %90 {strides = array<i32>} : memref<2x24x128xf32, #tpu.memory_space<vmem>>, vector<1x24x128xf32>,
    %91 = arith.addf %52, %86 : vector<24x128xf32>
    %92 = arith.mulf %86, %86 : vector<24x128xf32>
    %93 = arith.addf %54, %92 : vector<24x128xf32>
    %c2_i32 = arith.constant 2 : i32
    %94 = vector.shape_cast %91 : vector<24x128xf32> to vector<1x24x128xf32>
    %cst_40 = arith.constant dense<0.000000e+00> : vector<1xf32>
    %95 = vector.multi_reduction <add>, %94, %cst_40 [1, 2] : vector<1x24x128xf32> to vector<1xf32>
    %96 = vector.shape_cast %95 : vector<1xf32> to vector<1x1x1xf32>
    %97 = vector.extract %96[0, 0, 0] : f32 from vector<1x1x1xf32>
    %98 = vector.shape_cast %93 : vector<24x128xf32> to vector<1x24x128xf32>
    %cst_41 = arith.constant dense<0.000000e+00> : vector<1xf32>
    %99 = vector.multi_reduction <add>, %98, %cst_41 [1, 2] : vector<1x24x128xf32> to vector<1xf32>
    %100 = vector.shape_cast %99 : vector<1xf32> to vector<1x1x1xf32>
    %101 = vector.extract %100[0, 0, 0] : f32 from vector<1x1x1xf32>
    %102 = vector.broadcast %97 : f32 to vector<1x1x1xf32>
    %c0_42 = arith.constant 0 : index
    %c0_43 = arith.constant 0 : index
    %c0_44 = arith.constant 0 : index
    %103 = vector.load %arg3[%c0_42, %c0_43, %c0_44] : memref<1x1x1xf32, #tpu.memory_space<vmem>>, vector<1x1x1xf32>
    tpu.vector_store %arg3[%c0_42, %c0_43, %c0_44], %102 {strides = array<i32>} : memref<1x1x1xf32, #tpu.memory_space<vmem>>, vector<1x1x1xf32>,
    %104 = vector.broadcast %101 : f32 to vector<1x1x1xf32>
    %c0_45 = arith.constant 0 : index
    %c0_46 = arith.constant 0 : index
    %c0_47 = arith.constant 0 : index
    %105 = vector.load %arg4[%c0_45, %c0_46, %c0_47] : memref<1x1x1xf32, #tpu.memory_space<vmem>>, vector<1x1x1xf32>
    tpu.vector_store %arg4[%c0_45, %c0_46, %c0_47], %104 {strides = array<i32>} : memref<1x1x1xf32, #tpu.memory_space<vmem>>, vector<1x1x1xf32>,
    return
  }
  func.func @transform_0(%arg0: i32) -> (i32, i32, i32, i32) {
    %c0_i32 = arith.constant 0 : i32
    %c0_i32_0 = arith.constant 0 : i32
    %c0_i32_1 = arith.constant 0 : i32
    %c0_i32_2 = arith.constant 0 : i32
    return %arg0, %c0_i32, %c0_i32_0, %c0_i32_1 : i32, i32, i32, i32
  }
  func.func @transform_1(%arg0: i32) -> (i32, i32, i32) {
    %c0_i32 = arith.constant 0 : i32
    %c0_i32_0 = arith.constant 0 : i32
    %c0_i32_1 = arith.constant 0 : i32
    return %arg0, %c0_i32, %c0_i32_0 : i32, i32, i32
  }
  func.func @transform_2(%arg0: i32) -> (i32, i32, i32) {
    %c0_i32 = arith.constant 0 : i32
    %c0_i32_0 = arith.constant 0 : i32
    %c0_i32_1 = arith.constant 0 : i32
    return %arg0, %c0_i32, %c0_i32_0 : i32, i32, i32
  }
  func.func @transform_3(%arg0: i32) -> (i32, i32, i32) {
    %c0_i32 = arith.constant 0 : i32
    %c0_i32_0 = arith.constant 0 : i32
    %c0_i32_1 = arith.constant 0 : i32
    return %arg0, %c0_i32, %c0_i32_0 : i32, i32, i32
  }
}

</mosaic_0001>

<bundles_post_ra>
// kernel: sobel_conv.3
= control target key start
LH: loop header
LB: loop body
LE: loop exit
PB: predicated region body
PF: predicated region fallthrough
CT: control target
= control target key end

     0   :  { %7 = vsyncpa [#allocation4], 0  ;;  %s152_s0 = inlined_call_operand.vmem [shape: f32[2], index: 0, kind: input, shape index: {}]   ;;  %s153_s1 = inlined_call_operand.vmem [shape: f32[2,24,128], index: 1, kind: input, shape index: {}]   ;;  %s154_s2 = inlined_call_operand.hbm [shape: f32[2,1,16,16], index: 2, kind: output, shape index: {}]  }
   0x1   :  { %8 = vsyncpa [#allocation3], 0  ;;  %s15_s11 = sshll.u32 %s152_s0, 4  ;;  %s16_s11 = int_to_ptr.vmem [resolvable:$true] %s15_s11 }
   0x2   :  { %s68_s12 = scalar_lea.vmem %s16_s11, 16  ;;  %p73_p1 = scmp.lt.s32.totalorder %s16_s11, %s16_s11 }
   0x3   :  { %p69_p0 = scmp.ne.s32.totalorder %s16_s11, %s68_s12  ;;  %p74_p2 = scmp.lt.s32.totalorder %s68_s12, %s68_s12 }
   0x5   :  { %p75_p3 = por %p74_p2, %p73_p1 }
   0x7   :  { %p76_p4 = pnand %p75_p3, %p69_p0 }
   0x9   :  { %79 = shalt.err (!%p76_p4)
}
   0xa   :  { %s106_s13 = smov [#allocation2]  }
   0xb   :  { %18 = dma.vmem_to_smem %s16_s11, 16, %s106_s13, [#allocation4]  }
   0xc   :  { %102 = dma.done.wait [#allocation4], 16  }
   0xd   :  { %103 = vsyncadd [#allocation4], 4294967280 }
   0xe   :  { %24 = sfence }
   0xf   :  { %s29_s14 = sld [smem:[#allocation2]]  ;;  %s63_s15 = sld [smem:[#allocation2 + $0x1]]  ;;  %v25_v0 = vld [vmem:[%s153_s1] sm:$0xff]  ;;  %v26_v1 = vld [vmem:[%s153_s1 + $0x8] sm:$0xff]  ;;  %v27_v2 = vld [vmem:[%s153_s1 + $0x18] sm:$0xff]  ;;  %vm41_vm0 = vcmask 130048  }
  0x10   :  { %v28_v3 = vld [vmem:[%s153_s1 + $0x20] sm:$0xff]  ;;  %s107_s23 = smov [#allocation5]  }
  0x11   :  { %s51_s24 = sshll.u32 %s107_s23, 4  ;;  %s52_s24 = int_to_ptr.vmem [resolvable:$true] %s51_s24 }
  0x12   :  { %s80_s25 = scalar_lea.vmem %s52_s24, 512  ;;  %p85_p6 = scmp.lt.s32.totalorder %s52_s24, %s52_s24 }
  0x13   :  { %p81_p5 = scmp.ne.s32.totalorder %s52_s24, %s80_s25  ;;  %p86_p7 = scmp.lt.s32.totalorder %s80_s25, %s80_s25 }
  0x15   :  { %v30_v4 = vstv %s29_s14  ;;  %v36_v5 = vstv %s63_s15  ;;  %p87_p8 = por %p86_p7, %p85_p6 }
  0x16   :  { %v31_v6 = vmul.f32 %v30_v4, %v25_v0  ;;  %v32_v7 = vmul.f32 %v30_v4, %v26_v1  ;;  %v33_v8 = vmul.f32 %v30_v4, %v27_v2  ;;  %v34_v9 = vmul.f32 %v30_v4, %v28_v3 }
  0x17   :  { %p88_p9 = pnand %p87_p8, %p81_p5 }
  0x18   :  { %v37_v10 = vadd.f32 %v36_v5, %v31_v6  ;;  %v38_v11 = vadd.f32 %v36_v5, %v32_v7  ;;  %v39_v12 = vadd.f32 %v36_v5, %v33_v8  ;;  %v40_v13 = vadd.f32 %v36_v5, %v34_v9 }
  0x1a   :  { %42 = vst.msk [vmem:[#allocation5] sm:$0xff] %vm41_vm0, %v37_v10  ;;  %43 = vst.msk [vmem:[#allocation5 + $0x8] sm:$0xff] %vm41_vm0, %v38_v11 }
  0x1b   :  { %44 = vst.msk [vmem:[#allocation5 + $0x10] sm:$0xff] %vm41_vm0, %v39_v12  ;;  %45 = vst.msk [vmem:[#allocation5 + $0x18] sm:$0xff] %vm41_vm0, %v40_v13 }
  0x1c   :  { %91 = shalt.err (!%p88_p9)
}
  0x1d   :  { %s92_s27 = scalar_lea.hbm %s154_s2, 512 }
  0x1e   :  { %p93_p10 = scmp.ne.s32.totalorder %s154_s2, %s92_s27  ;;  %p96_p11 = scmp.lt.u32.totalorder %s92_s27, %s154_s2 }
  0x20   :  { %p98_p12 = pnand %p96_p11, %p93_p10 }
  0x22   :  { %101 = shalt.err (!%p98_p12)
}
  0x23   :  { %s108_s4 = smov 128   ;;  %s109_s5 = smov 8  }
  0x24   :  { %57 = dma.vmem_to_hbm [thread:$0]  %s52_s24, 512, %s154_s2, [#allocation3], %s108_s4, %s108_s4, %s109_s5  }
  0x25   :  { %104 = dma.done.wait [#allocation3], 512  }
  0x26   :  { %105 = vsyncadd [#allocation3], 4294966784 }
  0x27   :  { %61 = vsyncpa [#allocation3], 1 }
  0x28   :  { %62 = vsyncpa [#allocation4], 1 }

// kernel: sobel_conv.2
= control target key start
LH: loop header
LB: loop body
LE: loop exit
PB: predicated region body
PF: predicated region fallthrough
CT: control target
= control target key end

     0   :  { %9 = vsyncpa [#allocation4], 0  ;;  %s520_s0 = inlined_call_operand.hbm [shape: f32[2,3,16,16], index: 0, kind: input, shape index: {}]   ;;  %s521_s1 = inlined_call_operand.vmem [shape: f32[2,24,128], index: 1, kind: output, shape index: {0}]   ;;  %s522_s2 = inlined_call_operand.hbm [shape: f32[1,1,1], index: 2, kind: output, shape index: {1}]   ;;  %s523_s3 = inlined_call_operand.hbm [shape: f32[1,1,1], index: 3, kind: output, shape index: {2}]  }
   0x1   :  { %10 = vsyncpa [#allocation5], 0 }
   0x2   :  { %11 = vsyncpa [#allocation8], 0  ;;  %s358_s12 = smov [#allocation3]   ;;  %s286_s16 = scalar_lea.hbm %s520_s0, 1536 }
   0x3   :  { %s17_s13 = sshll.u32 %s358_s12, 4  ;;  %p287_p0 = scmp.ne.s32.totalorder %s520_s0, %s286_s16  ;;  %s18_s13 = int_to_ptr.vmem [resolvable:$true] %s17_s13 }
   0x4   :  { %p290_p1 = scmp.lt.u32.totalorder %s286_s16, %s520_s0 }
   0x6   :  { %p292_p2 = pnand %p290_p1, %p287_p0 }
   0x8   :  { %295 = shalt.err (!%p292_p2)
}
   0x9   :  { %s296_s21 = scalar_lea.vmem %s18_s13, 1536  ;;  %p301_p4 = scmp.lt.s32.totalorder %s18_s13, %s18_s13 }
   0xa   :  { %p297_p3 = scmp.ne.s32.totalorder %s18_s13, %s296_s21  ;;  %p302_p5 = scmp.lt.s32.totalorder %s296_s21, %s296_s21 }
   0xc   :  { %p303_p6 = por %p302_p5, %p301_p4 }
   0xe   :  { %p304_p7 = pnand %p303_p6, %p297_p3 }
  0x10   :  { %307 = shalt.err (!%p304_p7)
}
  0x11   :  { %s359_s22 = smov 128   ;;  %s360_s23 = smov 8  }
  0x12   :  { %23 = dma.hbm_to_vmem [thread:$0]  %s520_s0, 1536, %s18_s13, [#allocation4], %s359_s22, %s359_s22, %s360_s23  }
  0x13   :  { %352 = dma.done.wait [#allocation4], 1536  }
  0x14   :  { %353 = vsyncadd [#allocation4], 4294965760  ;;  %vm28_vm0 = vcmask 1047680   ;;  %v361_v0 = vmov 0.0   ;;  %s362_s26 = smov 1   ;;  %s363_s27 = smov 127   ;;  %v31_v37 = vlaneseq }
  0x15   :  { %76 = vrot.lane.b32.xlu1 %v361_v0, %s362_s26  ;;  %85 = vrot.lane.b32.xlu0 %v361_v0, %s363_s27  ;;  %29 = vst.msk [vmem:[#allocation2] sm:$0xff] %vm28_vm0, %v361_v0  ;;  %30 = vst.msk [vmem:[#allocation2 + $0x8] sm:$0xff] %vm28_vm0, %v361_v0  ;;  %v50_v1 = vld [vmem:[#allocation3] sm:$0xff]  ;;  %v52_v2 = vld [vmem:[#allocation3 + $0x10] sm:$0xff]  ;;  %vm66_vm1 = vcmask 130048   ;;  %vm234_vm10 = vcmask 0  }
  0x16   :  { %v54_v3 = vld [vmem:[#allocation3 + $0x20] sm:$0xff]  ;;  %v56_v4 = vmul.f32 0.299, %v50_v1  ;;  %v58_v5 = vmul.f32 0.587, %v52_v2  ;;  %v132_v7 = vld [vmem:[#allocation3 + $0x30] sm:$0xff] }
  0x17   :  { %v62_v6 = vmul.f32 0.114, %v54_v3  ;;  %v134_v8 = vld [vmem:[#allocation3 + $0x40] sm:$0xff]  ;;  %v136_v10 = vld [vmem:[#allocation3 + $0x50] sm:$0xff]  ;;  %v138_v11 = vmul.f32 0.299, %v132_v7 }
  0x18   :  { %v60_v9 = vadd.f32 %v58_v5, %v56_v4  ;;  %v140_v12 = vmul.f32 0.587, %v134_v8  ;;  %v51_v13 = vld [vmem:[#allocation3 + $0x8] sm:$0xff]  ;;  %v53_v14 = vld [vmem:[#allocation3 + $0x18] sm:$0xff]  ;;  %v144_v21 = vmul.f32 0.114, %v136_v10 }
  0x19   :  { %157 = vrot.lane.b32.xlu1 %v361_v0, %s362_s26  ;;  %v55_v15 = vld [vmem:[#allocation3 + $0x28] sm:$0xff]  ;;  %v57_v17 = vmul.f32 0.299, %v51_v13  ;;  %v59_v18 = vmul.f32 0.587, %v53_v14  ;;  %v133_v19 = vld [vmem:[#allocation3 + $0x38] sm:$0xff] }
  0x1a   :  { %v64_v16 = vadd.f32 %v62_v6, %v60_v9  ;;  %v135_v20 = vld [vmem:[#allocation3 + $0x48] sm:$0xff]  ;;  %v63_v22 = vmul.f32 0.114, %v55_v15  ;;  %v142_v23 = vadd.f32 %v140_v12, %v138_v11  ;;  %v139_v25 = vmul.f32 0.299, %v133_v19  ;;  %v137_v27 = vld [vmem:[#allocation3 + $0x58] sm:$0xff] }
  0x1b   :  { %v61_v24 = vadd.f32 %v59_v18, %v57_v17  ;;  %v141_v26 = vmul.f32 0.587, %v135_v20  ;;  %v145_v31 = vmul.f32 0.114, %v137_v27  ;;  %v422_v40 = vshrl.u32 %v31_v37, 7  ;;  %s365_s14 = smov [#allocation7]  }
  0x1c   :  { %67 = vst.msk [vmem:[#allocation2] sm:$0xff] %vm66_vm1, %v64_v16  ;;  %v146_v29 = vadd.f32 %v144_v21, %v142_v23  ;;  %v36_v43 = vand.u32 127, %v31_v37  ;;  %s256_s15 = sshll.u32 %s365_s14, 4  ;;  %s487_s15 = int_to_ptr.vmem [resolvable:$true] %s256_s15 }
  0x1d   :  { %v65_v28 = vadd.f32 %v63_v22, %v61_v24  ;;  %v143_v30 = vadd.f32 %v141_v26, %v139_v25  ;;  %v34_v42 = vadd.s32 16, %v422_v40  ;;  %v33_v45 = vadd.s32 8, %v422_v40 }
  0x1e   :  { %v40_v47 = vsub.s32 15, %v36_v43  ;;  %v37_v52 = vsub.s32 15, %v422_v40  ;;  %vm93_vm3 = vcmp.lt.s32.totalorder %v422_v40, 1  ;;  %vm103_vm4 = vcmp.lt.s32.totalorder %v422_v40, 7 }
  0x1f   :  { %68 = vst.msk [vmem:[#allocation2 + $0x8] sm:$0xff] %vm66_vm1, %v65_v28  ;;  %v147_v33 = vadd.f32 %v145_v31, %v143_v30  ;;  %v39_v46 = vsub.s32 15, %v34_v42  ;;  %v38_v53 = vsub.s32 15, %v33_v45 }
  0x20   :  { %vm41_vm5 = vcmp.lt.s32.totalorder %v37_v52, %v40_v47 }
  0x21   :  { %vm45_vm2 = vcmp.lt.s32.totalorder %v39_v46, %v40_v47  ;;  %vm43_vm6 = vcmp.lt.s32.totalorder %v38_v53, %v40_v47  ;;  %v42_v8 = vsel %vm41_vm5, %v37_v52, %v40_v47 }
  0x22   :  { %v429_v63 = vsel %vm45_vm2, %v39_v46, %v40_v47  ;;  %v44_v13 = vsel %vm43_vm6, %v38_v53, %v40_v47  ;;  %vm47_vm7 = vcmp.ge.s32.totalorder %v42_v8, 0 }
  0x23   :  { %v69_v32 = vld [vmem:[#allocation2] sm:$0xff]  ;;  %vm49_vm8 = vcmp.ge.s32.totalorder %v429_v63, 0  ;;  %vm48_vm9 = vcmp.ge.s32.totalorder %v44_v13, 0 }
  0x24   :  { %148 = vst.msk [vmem:[#allocation2] sm:$0xff] %vm66_vm1, %v146_v29  ;;  %72 = vrot.lane.b32.xlu0 %v69_v32, %s362_s26  ;;  %v110_v62 = vmul.f32 9.0, %v69_v32 }
  0x26   :  { %v70_v34 = vld [vmem:[#allocation2 + $0x8] sm:$0xff] }
  0x27   :  { %149 = vst.msk [vmem:[#allocation2 + $0x8] sm:$0xff] %vm66_vm1, %v147_v33  ;;  %83 = vrot.lane.b32.xlu1 %v70_v34, %s363_s27  ;;  %v111_v9 = vmul.f32 9.0, %v70_v34 }
  0x28   :  { %74 = vrot.lane.b32.xlu0 %v70_v34, %s362_s26 }
  0x2b   :  { %v408_v35 = vld [vmem:[#allocation2] sm:$0xff] }
  0x2c   :  { %81 = vrot.lane.b32.xlu0 %v69_v32, %s363_s27  ;;  %153 = vrot.lane.b32.xlu1 %v408_v35, %s362_s26  ;;  %v189_v37 = vmul.f32 9.0, %v408_v35 }
  0x2e   :  { %v413_v36 = vld [vmem:[#allocation2 + $0x8] sm:$0xff] }
  0x30   :  { %155 = vrot.lane.b32.xlu0 %v413_v36, %s362_s26  ;;  %162 = vrot.lane.b32.xlu1 %v408_v35, %s363_s27 }
  0x34   :  { %164 = vrot.lane.b32.xlu0 %v413_v36, %s363_s27  ;;  %166 = vrot.lane.b32.xlu1 %v361_v0, %s363_s27 }
  0x87   :  { %v77_v38 = vpop.permute.xlu1 %76  ;;  %v86_v39 = vpop.permute.xlu0 %85 }
  0x88   :  { %v89_v50 = vadd.f32 %v86_v39, %v77_v38 }
  0x8a   :  { %v92_v58 = vrot.slane %v89_v50, 7  ;;  %v102_v61 = vrot.slane %v89_v50, 1 }
  0x8b   :  { %v158_v41 = vpop.permute.xlu1 %157 }
  0x96   :  { %v73_v44 = vpop.permute.xlu0 %72 }
  0x97   :  { %v78_v54 = vadd.f32 %v73_v44, %v69_v32 }
  0x99   :  { %v84_v49 = vpop.permute.xlu1 %83 }
  0x9a   :  { %v75_v48 = vpop.permute.xlu0 %74 }
  0x9b   :  { %v79_v51 = vadd.f32 %v75_v48, %v70_v34 }
  0x9d   :  { %v88_v55 = vadd.f32 %v84_v49, %v79_v51 }
  0x9e   :  { %v82_v56 = vpop.permute.xlu0 %81  ;;  %v154_v57 = vpop.permute.xlu1 %153 }
  0x9f   :  { %v91_v59 = vrot.slane %v88_v55, 7  ;;  %v87_v60 = vadd.f32 %v82_v56, %v78_v54  ;;  %v101_v1 = vrot.slane %v88_v55, 1  ;;  %v159_v5 = vadd.f32 %v154_v57, %v408_v35 }
  0xa0   :  { %v190_v35 = vmul.f32 9.0, %v413_v36 }
  0xa1   :  { %v94_v0 = vsel %vm93_vm3, %v91_v59, %v92_v58  ;;  %v90_v2 = vrot.slane %v87_v60, 7  ;;  %v100_v3 = vrot.slane %v87_v60, 1  ;;  %v104_v17 = vsel %vm103_vm4, %v101_v1, %v102_v61 }
  0xa2   :  { %v99_v4 = vadd.f32 %v94_v0, %v89_v50  ;;  %v156_v6 = vpop.permute.xlu0 %155  ;;  %v163_v7 = vpop.permute.xlu1 %162 }
  0xa3   :  { %v95_v10 = vsel %vm93_vm3, %v90_v2, %v91_v59  ;;  %v96_v11 = vsel %vm93_vm3, %v92_v58, %v90_v2  ;;  %v106_v12 = vsel %vm103_vm4, %v102_v61, %v100_v3  ;;  %v168_v16 = vadd.f32 %v163_v7, %v159_v5 }
  0xa4   :  { %v97_v14 = vadd.f32 %v96_v11, %v87_v60  ;;  %v98_v15 = vadd.f32 %v95_v10, %v88_v55  ;;  %v105_v18 = vsel %vm103_vm4, %v100_v3, %v101_v1  ;;  %v160_v19 = vadd.f32 %v156_v6, %v413_v36 }
  0xa5   :  { %v109_v20 = vadd.f32 %v106_v12, %v99_v4  ;;  %v171_v29 = vrot.slane %v168_v16, 7  ;;  %v180_v43 = vrot.slane %v168_v16, 1 }
  0xa6   :  { %v107_v21 = vadd.f32 %v105_v18, %v97_v14  ;;  %v165_v22 = vpop.permute.xlu0 %164  ;;  %v167_v23 = vpop.permute.xlu1 %166  ;;  %v108_v24 = vadd.f32 %v104_v17, %v98_v15 }
  0xa7   :  { %v169_v25 = vadd.f32 %v165_v22, %v160_v19  ;;  %v170_v26 = vadd.f32 %v167_v23, %v158_v41  ;;  %v115_v27 = vsub.f32 0.0, %v109_v20 }
  0xa8   :  { %v113_v28 = vsub.f32 %v110_v62, %v107_v21  ;;  %v114_v30 = vsub.f32 %v111_v9, %v108_v24 }
  0xa9   :  { %v172_v31 = vrot.slane %v169_v25, 7  ;;  %v181_v32 = vrot.slane %v169_v25, 1  ;;  %v173_v33 = vrot.slane %v170_v26, 7  ;;  %v182_v34 = vrot.slane %v170_v26, 1 }
  0xaa   :  { %v116_v38 = vsel %vm47_vm7, %v113_v28, 0.0  ;;  %v117_v39 = vsel %vm48_vm9, %v114_v30, 0.0  ;;  %v118_v42 = vsel %vm49_vm8, %v115_v27, 0.0 }
  0xab   :  { %v175_v41 = vsel %vm93_vm3, %v171_v29, %v172_v31  ;;  %v174_v44 = vsel %vm93_vm3, %v172_v31, %v173_v33  ;;  %v176_v45 = vsel %vm93_vm3, %v173_v33, %v171_v29  ;;  %119 = vst [vmem:[%s521_s1] sm:$0xff] %v116_v38  ;;  %120 = vst [vmem:[%s521_s1 + $0x8] sm:$0xff] %v117_v39 }
  0xac   :  { %121 = vst [vmem:[%s521_s1 + $0x10] sm:$0xff] %v118_v42  ;;  %v178_v46 = vadd.f32 %v175_v41, %v169_v25  ;;  %v177_v47 = vadd.f32 %v176_v45, %v168_v16  ;;  %v179_v48 = vadd.f32 %v174_v44, %v170_v26  ;;  %v184_v49 = vsel %vm103_vm4, %v180_v43, %v181_v32 }
  0xad   :  { %v183_v50 = vsel %vm103_vm4, %v181_v32, %v182_v34  ;;  %v185_v51 = vsel %vm103_vm4, %v182_v34, %v180_v43  ;;  %v125_v61 = vmul.f32 %v116_v38, %v116_v38  ;;  %v126_v0 = vmul.f32 %v117_v39, %v117_v39 }
  0xae   :  { %v187_v52 = vadd.f32 %v183_v50, %v178_v46  ;;  %v188_v53 = vadd.f32 %v185_v51, %v179_v48  ;;  %v186_v54 = vadd.f32 %v184_v49, %v177_v47  ;;  %v127_v5 = vmul.f32 %v118_v42, %v118_v42 }
  0xb0   :  { %v192_v55 = vsub.f32 %v189_v37, %v186_v54  ;;  %v193_v56 = vsub.f32 %v190_v35, %v187_v52  ;;  %v194_v57 = vsub.f32 0.0, %v188_v53 }
  0xb2   :  { %v195_v36 = vsel %vm47_vm7, %v192_v55, 0.0  ;;  %v196_v58 = vsel %vm48_vm9, %v193_v56, 0.0  ;;  %v197_v59 = vsel %vm49_vm8, %v194_v57, 0.0 }
  0xb3   :  { %271 = vst [vmem:[%s521_s1 + $0x18] sm:$0xff] %v195_v36  ;;  %272 = vst [vmem:[%s521_s1 + $0x20] sm:$0xff] %v196_v58  ;;  %v202_v40 = vadd.f32 %v195_v36, %v116_v38  ;;  %v203_v60 = vadd.f32 %v196_v58, %v117_v39  ;;  %v205_v62 = vmul.f32 %v195_v36, %v195_v36 }
  0xb4   :  { %273 = vst [vmem:[%s521_s1 + $0x28] sm:$0xff] %v197_v59  ;;  %v206_v1 = vmul.f32 %v196_v58, %v196_v58  ;;  %v207_v63 = vmul.f32 %v197_v59, %v197_v59  ;;  %v204_v2 = vadd.f32 %v197_v59, %v118_v42  ;;  %s364_s1 = smov [#allocation6]  }
  0xb5   :  { %v211_v3 = vadd.f32 %v203_v60, %v202_v40  ;;  %v208_v4 = vadd.f32 %v205_v62, %v125_v61  ;;  %s246_s12 = sshll.u32 %s364_s1, 4  ;;  %s247_s12 = int_to_ptr.vmem [resolvable:$true] %s246_s12 }
  0xb6   :  { %v209_v6 = vadd.f32 %v206_v1, %v126_v0  ;;  %v210_v8 = vadd.f32 %v207_v63, %v127_v5  ;;  %s308_s17 = scalar_lea.vmem %s247_s12, 16  ;;  %s312_s18 = scalar_lea.vmem %s247_s12, 32 }
  0xb7   :  { %v212_v7 = vadd.f32 %v211_v3, %v204_v2  ;;  %p309_p8 = scmp.ne.s32.totalorder %s247_s12, %s308_s17  ;;  %p313_p9 = scmp.lt.s32.totalorder %s247_s12, %s247_s12 }
  0xb8   :  { %v222_v9 = vadd.f32 %v209_v6, %v208_v4  ;;  %p314_p10 = scmp.lt.s32.totalorder %s312_s18, %s308_s17 }
  0xb9   :  { %213 = vadd.xlane.f32.xlu0 %v212_v7 }
  0xba   :  { %v223_v10 = vadd.f32 %v222_v9, %v210_v8  ;;  %p315_p11 = por %p314_p10, %p313_p9 }
  0xbc   :  { %224 = vadd.xlane.f32.xlu1 %v223_v10  ;;  %p316_p12 = pnand %p315_p11, %p309_p8 }
 0x146   :  { %v214_v11 = vpop.xlane.xlu0 %213 }
 0x147   :  { %v215_v12 = vrot.slane %v214_v11, 4 }
 0x149   :  { %v216_v13 = vadd.f32 %v215_v12, %v214_v11  ;;  %v225_v14 = vpop.xlane.xlu1 %224 }
 0x14a   :  { %v226_v15 = vrot.slane %v225_v14, 4 }
 0x14b   :  { %v217_v16 = vrot.slane %v216_v13, 2 }
 0x14c   :  { %v227_v17 = vadd.f32 %v226_v15, %v225_v14 }
 0x14d   :  { %v218_v18 = vadd.f32 %v217_v16, %v216_v13 }
 0x14e   :  { %v228_v19 = vrot.slane %v227_v17, 2 }
 0x14f   :  { %v219_v20 = vrot.slane %v218_v18, 1 }
 0x150   :  { %v229_v21 = vadd.f32 %v228_v19, %v227_v17 }
 0x151   :  { %v220_v22 = vadd.f32 %v219_v20, %v218_v18 }
 0x152   :  { %v230_v23 = vrot.slane %v229_v21, 1 }
 0x153   :  { %274 = vpush %v220_v22 }
 0x154   :  { %v231_v24 = vadd.f32 %v230_v23, %v229_v21 }
 0x156   :  { %276 = vpush %v231_v24 }
 0x184   :  { %s275_s13 = spop %274 }
 0x185   :  { %v233_v25 = vstv %s275_s13 }
 0x186   :  { %235 = vst.msk [vmem:[#allocation6] sm:$0x1] %vm234_vm10, %v233_v25 }
 0x187   :  { %s277_s16 = spop %276 }
 0x188   :  { %v236_v26 = vstv %s277_s16 }
 0x189   :  { %319 = shalt.err (!%p316_p12)
}
 0x18a   :  { %s320_s21 = scalar_lea.hbm %s522_s2, 16 }
 0x18b   :  { %p321_p13 = scmp.ne.s32.totalorder %s522_s2, %s320_s21  ;;  %p324_p0 = scmp.lt.u32.totalorder %s320_s21, %s522_s2 }
 0x18d   :  { %p326_p1 = pnand %p324_p0, %p321_p13 }
 0x18f   :  { %329 = shalt.err (!%p326_p1)
}
 0x190   :  { %249 = dma.vmem_to_hbm [thread:$0]  %s247_s12, 16, %s522_s2, [#allocation5]   ;;  %237 = vst.msk [vmem:[#allocation7] sm:$0x1] %vm234_vm10, %v236_v26 }
 0x191   :  { %s330_s0 = scalar_lea.vmem %s487_s15, 16  ;;  %s334_s28 = scalar_lea.vmem %s487_s15, 32 }
 0x192   :  { %p331_p2 = scmp.ne.s32.totalorder %s487_s15, %s330_s0  ;;  %p335_p3 = scmp.lt.s32.totalorder %s487_s15, %s487_s15 }
 0x193   :  { %p336_p4 = scmp.lt.s32.totalorder %s334_s28, %s330_s0 }
 0x195   :  { %p337_p5 = por %p336_p4, %p335_p3 }
 0x197   :  { %p338_p6 = pnand %p337_p5, %p331_p2 }
 0x199   :  { %341 = shalt.err (!%p338_p6)
}
 0x19a   :  { %s342_s4 = scalar_lea.hbm %s523_s3, 16 }
 0x19b   :  { %p343_p7 = scmp.ne.s32.totalorder %s523_s3, %s342_s4  ;;  %p346_p8 = scmp.lt.u32.totalorder %s342_s4, %s523_s3 }
 0x19d   :  { %p348_p9 = pnand %p346_p8, %p343_p7 }
 0x19f   :  { %351 = shalt.err (!%p348_p9)
}
 0x1a0   :  { %259 = dma.vmem_to_hbm [thread:$0]  %s487_s15, 16, %s523_s3, [#allocation8]  }
 0x1a1   :  { %354 = dma.done.wait [#allocation5], 16  }
 0x1a2   :  { %355 = vsyncadd [#allocation5], 4294967280 }
 0x1a3   :  { %356 = dma.done.wait [#allocation8], 16  }
 0x1a4   :  { %357 = vsyncadd [#allocation8], 4294967280 }
 0x1a5   :  { %268 = vsyncpa [#allocation4], 1 }
 0x1a6   :  { %269 = vsyncpa [#allocation5], 1 }
 0x1a7   :  { %270 = vsyncpa [#allocation8], 1 }

</bundles_post_ra>
